<compile_context>
chip_gen: v6e
topology: v6e:2x2x1
jax: 0.10.0
libtpu: 0.0.40
codegen_flags: <defaults>
</compile_context>

<pallas_src>
import math

import jax
import jax.numpy as jnp
from jax.experimental import pallas as pl
from jax.experimental.pallas import tpu as pltpu


def affine_kernel(x_ref, alpha_ref, beta_ref, o_ref):
    # x_ref/o_ref: (tm, td) tile; alpha_ref/beta_ref: (1, td), broadcast over
    # the row (sublane) axis.  One fused VPU mul-add per vreg.
    o_ref[...] = (x_ref[...] * alpha_ref[...] + beta_ref[...]).astype(o_ref.dtype)


# 2x double-buffered input + 2x double-buffered output tiles must stay under
# this budget — conservative so the same constants are safe on v5e/v6e/v7x.
_VMEM_TILE_BUDGET = 24 * 1024 * 1024
_VMEM_LIMIT_BYTES = 32 * 1024 * 1024
# ~2-4 MiB tiles reach ~85-86% of HBM roofline (measured, v6e); bias to the
# high end so per-step overhead stays hidden on v7x's faster HBM as well.
_TARGET_TILE_BYTES = 4 * 1024 * 1024


def _round_up(a, b):
    return -(-a // b) * b


def _round_down(a, b):
    return (a // b) * b


def affine(x, alpha, beta):
    """x: [..., D]; alpha, beta: [1, 1, D] (broadcast).  Returns x*alpha+beta."""
    orig_shape = x.shape
    D = orig_shape[-1]
    assert alpha.shape[-1] == D and beta.shape[-1] == D

    dtype = x.dtype
    itemsize = jnp.dtype(dtype).itemsize
    # Sublane packing multiple for the dtype (f32: 8, bf16: 16, int8/fp8: 32).
    sub = {4: 8, 2: 16, 1: 32}.get(itemsize, 8)

    x2 = x.reshape(-1, D)
    M = x2.shape[0]
    a2 = alpha.reshape(1, D)
    b2 = beta.reshape(1, D)

    # Lane-fold: if D is not a multiple of 128, fold k rows into the lane dim
    # so stores become full-width unmasked vst.  alpha/beta are tiny, so the
    # jnp.tile is free.  Exact because the op is per-row elementwise.
    if D % 128 != 0:
        k = 128 // math.gcd(D, 128)
        if k > 1 and M % k == 0:
            M = M // k
            D = D * k
            x2 = x2.reshape(M, D)
            a2 = jnp.tile(a2, (1, k))
            b2 = jnp.tile(b2, (1, k))

    # Lane-axis tile: keep full D if 4 minimal double-buffered tiles fit the
    # budget, otherwise tile D in multiples of 128 (compile-safe at any D).
    if 4 * sub * D * itemsize <= _VMEM_TILE_BUDGET:
        td = D
    else:
        td = max(128, _round_down(_VMEM_TILE_BUDGET // (4 * sub * itemsize), 128))

    # Row-axis tile: ~4 MiB per tile, capped by the 4-buffer VMEM budget and
    # so the row grid has >=~4 steps (pipelining + v7x 2-TC split).
    row_bytes = td * itemsize
    tm = max(sub, _round_down(_TARGET_TILE_BYTES // row_bytes, sub))
    tm_budget = max(sub, _round_down(_VMEM_TILE_BUDGET // (4 * row_bytes), sub))
    tm = min(tm, tm_budget)
    tm = min(tm, max(sub, _round_up(pl.cdiv(M, 4), sub)))

    grid = (pl.cdiv(M, tm), pl.cdiv(D, td))

    out = pl.pallas_call(
        affine_kernel,
        out_shape=jax.ShapeDtypeStruct((M, D), dtype),
        grid_spec=pltpu.PrefetchScalarGridSpec(
            num_scalar_prefetch=0,
            grid=grid,
            in_specs=[
                pl.BlockSpec((tm, td), lambda i, j: (i, j)),  # x tile
                pl.BlockSpec((1, td), lambda i, j: (0, j)),   # alpha (row-resident)
                pl.BlockSpec((1, td), lambda i, j: (0, j)),   # beta  (row-resident)
            ],
            out_specs=pl.BlockSpec((tm, td), lambda i, j: (i, j)),
        ),
        compiler_params=pltpu.CompilerParams(
            dimension_semantics=("parallel", "parallel"),
            vmem_limit_bytes=_VMEM_LIMIT_BYTES,
        ),
    )(x2, a2, b2)

    return out.reshape(orig_shape)


if __name__ == "__main__":
    key = jax.random.PRNGKey(0)
    kx, ka, kb, kx2, kx3 = jax.random.split(key, 5)

    # Small shapes consistent with the module: x [B, N, D], params [1, 1, D].
    B, N, D = 2, 8, 128
    x = jax.random.normal(kx, (B, N, D), dtype=jnp.float32)
    # Module __init__ sets alpha/beta to ones; perturb deterministically so
    # the test is non-trivial while keeping the same shapes/dtypes.
    alpha = jnp.ones((1, 1, D), jnp.float32) + 0.1 * jax.random.normal(ka, (1, 1, D), jnp.float32)
    beta = jnp.ones((1, 1, D), jnp.float32) + 0.1 * jax.random.normal(kb, (1, 1, D), jnp.float32)

    out = jax.block_until_ready(affine(x, alpha, beta))
    ref = x * alpha + beta
    assert out.shape == (B, N, D)
    assert out.dtype == x.dtype
    assert jnp.allclose(out, ref, atol=1e-6, rtol=1e-6)

    # Ragged row count (M = 10 rows, not a multiple of the 8-row tile):
    # exercises the pad-free masked edge-block path.
    x_b = jax.random.normal(kx2, (2, 5, D), dtype=jnp.float32)
    out_b = jax.block_until_ready(affine(x_b, alpha, beta))
    ref_b = x_b * alpha + beta
    assert out_b.shape == (2, 5, D)
    assert jnp.allclose(out_b, ref_b, atol=1e-6, rtol=1e-6)

    # D not a multiple of 128 (D=96): exercises the lane-folding path.
    D3 = 96
    x_c = jax.random.normal(kx3, (2, 16, D3), dtype=jnp.float32)
    alpha3 = jnp.full((1, 1, D3), 1.5, jnp.float32)
    beta3 = jnp.full((1, 1, D3), -0.25, jnp.float32)
    out_c = jax.block_until_ready(affine(x_c, alpha3, beta3))
    ref_c = x_c * alpha3 + beta3
    assert out_c.shape == (2, 16, D3)
    assert jnp.allclose(out_c, ref_c, atol=1e-6, rtol=1e-6)

    print("KERNEL_OK")
</pallas_src>

<mosaic_0001>
module attributes {stable_mosaic.version = 11 : i64} {
  func.func @affine_kernel(%arg0: i32, %arg1: i32, %arg2: memref<8x128xf32, #tpu.memory_space<vmem>>, %arg3: memref<1x128xf32, #tpu.memory_space<vmem>>, %arg4: memref<1x128xf32, #tpu.memory_space<vmem>>, %arg5: memref<8x128xf32, #tpu.memory_space<vmem>>) attributes {dimension_semantics = [#tpu.dimension_semantics<parallel>, #tpu.dimension_semantics<parallel>], iteration_bounds = array<i64: 2, 1>, scalar_prefetch = 0 : i64, scratch_operands = 0 : i64, tpu.core_type = #tpu.core_type<tc>, window_params = [{transform_indices = @transform_0, window_bounds = array<i64: 8, 128>}, {transform_indices = @transform_1, window_bounds = array<i64: 1, 128>}, {transform_indices = @transform_2, window_bounds = array<i64: 1, 128>}, {transform_indices = @transform_3, window_bounds = array<i64: 8, 128>}]} {
    %c0 = arith.constant 0 : index
    %c0_0 = arith.constant 0 : index
    %0 = vector.load %arg2[%c0, %c0_0] : memref<8x128xf32, #tpu.memory_space<vmem>>, vector<8x128xf32>
    %c0_1 = arith.constant 0 : index
    %c0_2 = arith.constant 0 : index
    %1 = vector.load %arg3[%c0_1, %c0_2] : memref<1x128xf32, #tpu.memory_space<vmem>>, vector<1x128xf32>
    %2 = vector.broadcast %1 : vector<1x128xf32> to vector<8x128xf32>
    %3 = arith.mulf %0, %2 : vector<8x128xf32>
    %c0_3 = arith.constant 0 : index
    %c0_4 = arith.constant 0 : index
    %4 = vector.load %arg4[%c0_3, %c0_4] : memref<1x128xf32, #tpu.memory_space<vmem>>, vector<1x128xf32>
    %5 = vector.broadcast %4 : vector<1x128xf32> to vector<8x128xf32>
    %6 = arith.addf %3, %5 : vector<8x128xf32>
    %c0_5 = arith.constant 0 : index
    %c0_6 = arith.constant 0 : index
    %7 = vector.load %arg5[%c0_5, %c0_6] : memref<8x128xf32, #tpu.memory_space<vmem>>, vector<8x128xf32>
    tpu.vector_store %arg5[%c0_5, %c0_6], %6 {strides = array<i32>} : memref<8x128xf32, #tpu.memory_space<vmem>>, vector<8x128xf32>,
    return
  }
  func.func @transform_0(%arg0: i32, %arg1: i32) -> (i32, i32) {
    %c0_i32 = arith.constant 0 : i32
    return %arg0, %arg1 : i32, i32
  }
  func.func @transform_1(%arg0: i32, %arg1: i32) -> (i32, i32) {
    %c0_i32 = arith.constant 0 : i32
    %c0_i32_0 = arith.constant 0 : i32
    return %c0_i32, %arg1 : i32, i32
  }
  func.func @transform_2(%arg0: i32, %arg1: i32) -> (i32, i32) {
    %c0_i32 = arith.constant 0 : i32
    %c0_i32_0 = arith.constant 0 : i32
    return %c0_i32, %arg1 : i32, i32
  }
  func.func @transform_3(%arg0: i32, %arg1: i32) -> (i32, i32) {
    %c0_i32 = arith.constant 0 : i32
    return %arg0, %arg1 : i32, i32
  }
}

</mosaic_0001>

<bundles_post_ra>
// kernel: tpu_custom_call.1
= control target key start
LH: loop header
LB: loop body
LE: loop exit
PB: predicated region body
PF: predicated region fallthrough
CT: control target
= control target key end

     0   :  { %8 = vsyncpa [#allocation3], 0  ;;  %s719_s0 = inlined_call_operand.hbm [shape: f32[16,128], index: 0, kind: input, shape index: {}]   ;;  %s720_s1 = inlined_call_operand.vmem [shape: f32[1,128], index: 1, kind: input, shape index: {}]   ;;  %s721_s2 = inlined_call_operand.vmem [shape: f32[1,128], index: 2, kind: input, shape index: {}]   ;;  %s722_s3 = inlined_call_operand.hbm [shape: f32[16,128], index: 3, kind: output, shape index: {}]  }
   0x1   :  { %10 = vsyncpa [#allocation3 + $0x1], 0 }
   0x2   :  { %11 = vsyncpa [#allocation4], 0 }
   0x3   :  { %13 = vsyncpa [#allocation4 + $0x1], 0  ;;  %s579_s12 = smov 0   ;;  %s581_s13 = smov 0  }
   0x4   :  { %s583_s14 = smov 0   ;;  %s585_s15 = smov 0  }
   0x5   :  { %s587_s16 = smov 0   ;;  %s589_s17 = smov 0  }
   0x6 LB: > { %s368_s18 = sadd.s32 4294967295, %s555_s17   ;;  %s369_s19 = sadd.s32 4294967294, %s555_s17   ;;  %s555_s17 = sphi %s589_s17, %s19_s17   ;;  %s551_s16 = sphi %s587_s16, %s734_s16   ;;  %s547_s15 = sphi %s585_s15, %s733_s15   ;;  %s543_s14 = sphi %s583_s14, %s732_s14   ;;  %s539_s13 = sphi %s581_s13, %s731_s13   ;;  %s535_s12 = sphi %s579_s12, %s730_s12  }
   0x7   : > { %s31_s20 = sadd.s32 1, %s551_s16  ;;  %s40_s21 = sadd.s32 1, %s543_s14 }
   0x8   : > { %p33_p0 = scmp.ge.s32.totalorder %s31_s20, 2  ;;  %p47_p1 = scmp.ne.s32.totalorder %s543_s14, %s539_s13 }
   0x9   : > { %p48_p2 = scmp.eq.s32.totalorder %s555_s17, 0  ;;  %p53_p3 = scmp.ne.s32.totalorder %s539_s13, %s535_s12 }
   0xa   : > { %s736_s20 = smov (%p33_p0, %s31_s20), 0  ;;  %p54_p5 = scmp.eq.s32.totalorder %s368_s18, 0 }
   0xb   : > { %p620_p4 = por %p48_p2, %p47_p1  ;;  %s35_s23 = ssub.s32 %s551_s16, %s736_s20 }
   0xc   : > { %p131_p6 = scmp.eq.s32.totalorder %s368_s18, 1  ;;  %p38_p7 = scmp.eq.s32.totalorder %s35_s23, 0 }
   0xd   : > { %p626_p8 = por %p54_p5, %p53_p3  ;;  %p137_p10 = scmp.eq.s32.totalorder %s369_s19, 1 }
   0xe   : > { %p630_p9 = por %p131_p6, %p47_p1  ;;  %p397_p13 = scmp.lt.s32.totalorder %s555_s17, 2 }
   0xf   : > { %s635_s26 = scalar_select %p38_p7, %s543_s14, %s40_s21  }
  0x10   : > { %p637_p11 = por %p137_p10, %p53_p3  ;;  %s169_s28 = sand.u32 1, %s543_s14  }
  0x11   : > { %s374_s29 = sshll.u32 %s169_s28, 3  ;;  %s375_s30 = sshll.u32 %s551_s16, 7 }
  0x12   : > { %s726_s27 = scalar_select %p637_p11, 1, 0 }
  0x13   : > { %s179_s6 = scalar_lea.hbm %s719_s0, %s375_s30  ;;  %s173_s7 = scalar_lea.vmem [#allocation2], %s374_s29 }
  0x14   : > { %s181_s8 = sshll.u32 %s173_s7, 4  ;;  %p650_p0 = pnand %p397_p13, %p620_p4  ;;  %s182_s8 = int_to_ptr.vmem [resolvable:$true] %s181_s8 }
  0x15   : > { %p376_p1 = scmp.ge.s32.totalorder %s555_s17, 1  ;;  %p186_p2 = scmp.lt.s32.totalorder %s555_s17, 3 }
  0x16   : > { %s170_s10 = scalar_lea.sflag [#allocation3], %s169_s28  ;;  %p449_p3 = pneg %p650_p0 }
  0x17   : > { %s460_s11 = scalar_lea.vmem %s182_s8, 128  ;;  %s557_s18 = smov [#allocation2]  }
  0x18   : > { %p461_p5 = scmp.ne.s32.totalorder %s182_s8, %s460_s11  ;;  %s465_s19 = sshll.u32 %s557_s18, 4  ;;  %s466_s19 = int_to_ptr.vmem [resolvable:$false] %s465_s19 }
  0x19   : > { %s467_s21 = scalar_lea.vmem %s466_s19, 256  ;;  %p468_p10 = scmp.lt.s32.totalorder %s182_s8, %s466_s19 }
  0x1a   : > { %p463_p6 = pnand %p461_p5, %p449_p3  ;;  %p469_p12 = scmp.lt.s32.totalorder %s467_s21, %s460_s11 }
  0x1c   : > { %p464_p7 = pneg %p463_p6  ;;  %p470_p4 = por %p469_p12, %p468_p10 }
  0x1e   : > { %p471_p13 = pnand %p470_p4, %p464_p7 }
  0x20   : > { %474 = shalt.err (!%p471_p13)
}
  0x21   : > { %392 = dma.hbm_to_vmem [thread:$0]  (!%p650_p0), %s179_s6, 128, %s182_s8, %s170_s10  }
  0x22   : > { %p187_p11 = pnand %p376_p1, %p186_p2 }
  0x23   : > { %s665_s22 = sand.u32 (!%p187_p11), 1, %s539_s13  }
  0x24   : > { %190 = sbr.rel (%p187_p11) target bundleno = 66 (0x42), region = 32  ;;  %s377_s23 = sshll.u32 (!%p187_p11), %s665_s22, 3 }
  0x25   : > { %s193_s28 = scalar_lea.sflag (!%p187_p11), [#allocation3], %s665_s22  ;;  %s196_s29 = scalar_lea.vmem (!%p187_p11), [#allocation2], %s377_s23 }
  0x29   : > { %526 = dma.done.wait (%p626_p8), %s193_s28, 128  }
  0x2a   : > { %528 = vsyncadd (%p626_p8), %s193_s28, 4294967168  ;;  %s224_s30 = scalar_lea.vmem [#allocation5], %s377_s23  ;;  %v231_v0 = vld [vmem:[%s196_s29] sm:$0xff]  ;;  %s382_s9 = sshll.u32 %s547_s15, 7 }
  0x2b   : > { %s264_s4 = sshll.u32 %s224_s30, 4  ;;  %v379_v1 = vld [vmem:[%s720_s1] ss:$0 sm:$0xff]  ;;  %s262_s11 = scalar_lea.hbm %s722_s3, %s382_s9  ;;  %s265_s4 = int_to_ptr.vmem [resolvable:$true] %s264_s4 }
  0x2c   : > { %v380_v2 = vld [vmem:[%s721_s2] ss:$0 sm:$0xff]  ;;  %v239_v3 = vmul.f32 %v379_v1, %v231_v0  ;;  %s250_s18 = scalar_lea.sflag [#allocation4], %s665_s22  ;;  %s475_s19 = scalar_lea.vmem %s265_s4, 128 }
  0x2d   : > { %p476_p8 = scmp.ne.s32.totalorder %s265_s4, %s475_s19  ;;  %s558_s21 = smov [#allocation5]  }
  0x2e   : > { %v247_v4 = vadd.f32 %v380_v2, %v239_v3  ;;  %s479_s23 = sshll.u32 %s558_s21, 4  ;;  %s480_s23 = int_to_ptr.vmem [resolvable:$false] %s479_s23 }
  0x2f   : > { %p477_p11 = pnand %p476_p8, %p630_p9  ;;  %s481_s28 = scalar_lea.vmem %s480_s23, 256 }
  0x30   : > { %248 = vst [vmem:[%s224_s30] sm:$0xff] %v247_v4  ;;  %p482_p0 = scmp.lt.s32.totalorder %s265_s4, %s480_s23  ;;  %p483_p1 = scmp.lt.s32.totalorder %s481_s28, %s475_s19 }
  0x31   : > { %p478_p12 = pneg %p477_p11 }
  0x32   : > { %p484_p2 = por %p483_p1, %p482_p0 }
  0x34   : > { %p485_p3 = pnand %p484_p2, %p478_p12 }
  0x36   : > { %488 = shalt.err (!%p485_p3)
}
  0x37   : > { %s489_s15 = scalar_lea.hbm %s262_s11, 128  ;;  %s493_s30 = scalar_lea.hbm %s722_s3, 256 }
  0x38   : > { %p490_p5 = scmp.ne.s32.totalorder %s262_s11, %s489_s15  ;;  %p494_p10 = scmp.lt.s32.totalorder %s262_s11, %s722_s3 }
  0x39   : > { %p495_p4 = scmp.lt.s32.totalorder %s493_s30, %s489_s15 }
  0x3a   : > { %p491_p6 = pnand %p490_p5, %p630_p9 }
  0x3b   : > { %p496_p13 = por %p495_p4, %p494_p10 }
  0x3c   : > { %p492_p7 = pneg %p491_p6 }
  0x3e   : > { %p497_p8 = pnand %p496_p13, %p492_p7 }
  0x40   : > { %500 = shalt.err (!%p497_p8)
}
  0x41   : > { %387 = dma.vmem_to_hbm [thread:$0]  (%p630_p9), %s265_s4, 128, %s262_s11, %s250_s18  }
  0x42 PF: > { %s276_s7 = sand.u32 1, %s535_s12   ;;  %p728_p11 = scmp.ne.s32.totalorder %s726_s27, 0 }
  0x43   : > { %p729_p12 = scmp.ge.s32.totalorder %s555_s17, 2  ;;  %s277_s8 = scalar_lea.sflag [#allocation4], %s276_s7 }
  0x45   : > { %p394_p0 = pnand %p729_p12, %p728_p11 }
  0x47   : > { %p395_p1 = pneg %p394_p0 }
  0x49   : > { %530 = dma.done.wait (%p395_p1), %s277_s8, 128  }
  0x4a   : > { %532 = vsyncadd (%p395_p1), %s277_s8, 4294967168  ;;  %s19_s17 = sadd.s32 1, %s555_s17   ;;  %s730_s12 = smov %s539_s13 }
  0x4b   : > { %p16_p2 = scmp.ge.s32.totalorder %s19_s17, 4   ;;  %s731_s13 = smov %s543_s14 }
  0x4c   : > { %s732_s14 = smov %s635_s26  ;;  %s733_s15 = smov %s551_s16 }
  0x4d   : > { %s734_s16 = smov %s736_s20  ;;  %18 = sbr.rel (!%p16_p2) target bundleno = 6 (0x6), region = 83 }
  0x52   :  { %282 = vsyncpa [#allocation3], 1 }
  0x53   :  { %284 = vsyncpa [#allocation3 + $0x1], 1 }
  0x54   :  { %285 = vsyncpa [#allocation4], 1 }
  0x55   :  { %287 = vsyncpa [#allocation4 + $0x1], 1 }

</bundles_post_ra>
